<compile_context>
chip_gen: v5e
topology: v5e:2x2
jax: 0.10.0
libtpu: 0.0.40
codegen_flags: <defaults>
</compile_context>

<pallas_src>
import jax
import jax.numpy as jnp
from jax.experimental import pallas as pl
from jax.experimental.pallas import tpu as pltpu


LANE = 512                           # lane-dense last dim (multiple of 128)
MAX_TILE_BYTES = 4 * 1024 * 1024     # ~4 MiB per streamed tile
PALLAS_MIN_ELEMS = 1 << 20           # below ~1M elems, fused XLA FMA wins
VMEM_LIMIT_BYTES = 32 * 1024 * 1024  # lift v5e's 16 MiB scoped-VMEM default


def _affine_kernel(p_ref, x_ref, o_ref):
    # p_ref: SMEM (2,) holding [w, b]. Scalar fused multiply-add on the VPU;
    # deliberately NOT jnp.dot — a 1x1 contraction would waste the MXU.
    w = p_ref[0]
    b = p_ref[1]
    o_ref[...] = x_ref[...] * w + b


def _sublane(dtype):
    # Minimum second-minor tile dim: 8 for 32-bit, 16 for 16-bit, 32 for 8-bit.
    return 32 // jnp.dtype(dtype).itemsize


def _pallas_affine(x_flat, params):
    """x_flat: (N,) params: (2,) [w, b] -> (N,) = x*w + b."""
    n = x_flat.shape[0]
    dtype = x_flat.dtype
    itemsize = jnp.dtype(dtype).itemsize
    sub = _sublane(dtype)

    # LANE-aligned prefix -> zero-copy reshape to a lane-dense 2-D slab.
    n_main = (n // LANE) * LANE
    if n_main == 0:
        return x_flat * params[0] + params[1]

    rows = n_main // LANE
    max_rows = max(sub, MAX_TILE_BYTES // (LANE * itemsize))  # 2048 for f32
    if rows < sub:
        tile_r = rows                       # full-extent block (allowed)
    else:
        tile_r = min(max_rows, (rows // sub) * sub)
    grid = (pl.cdiv(rows, tile_r),)         # partial last block masked by Pallas

    # Zero-copy when n is a LANE multiple (the common / auto-dispatched case).
    x2d = (x_flat if n_main == n else x_flat[:n_main]).reshape(rows, LANE)

    y2d = pl.pallas_call(
        _affine_kernel,
        out_shape=jax.ShapeDtypeStruct((rows, LANE), dtype),
        grid=grid,
        in_specs=[
            pl.BlockSpec(memory_space=pltpu.SMEM),           # packed [w, b]
            pl.BlockSpec((tile_r, LANE), lambda i: (i, 0)),   # streamed x tile
        ],
        out_specs=pl.BlockSpec((tile_r, LANE), lambda i: (i, 0)),
        compiler_params=pltpu.CompilerParams(
            dimension_semantics=("parallel",),
            vmem_limit_bytes=VMEM_LIMIT_BYTES,
        ),
    )(params, x2d)

    y_main = y2d.reshape(n_main)
    if n_main == n:
        return y_main
    # Rare unaligned-size path (<512-elem tail): plain-JAX FMA + concat.
    y_tail = x_flat[n_main:] * params[0] + params[1]
    return jnp.concatenate([y_main, y_tail])


def linear_regression_forward(x, weight, bias, *, force_pallas=False):
    """PyTorch nn.Linear(1, 1) forward. x: (N, 1) -> (N, 1)."""
    n, f = x.shape
    assert f == 1
    w = weight.reshape(())
    b = bias.reshape(())
    # Auto-dispatch: Pallas only when it is traffic-neutral (LANE-multiple N,
    # zero-copy reshape) and big enough to amortize launch + pipeline ramp.
    use_pallas = force_pallas or (n >= PALLAS_MIN_ELEMS and n % LANE == 0)
    if not use_pallas:
        return x * w + b
    params = jnp.stack([w, b]).astype(x.dtype)
    y_flat = _pallas_affine(x.reshape(-1), params)
    return y_flat.reshape(n, 1)


if __name__ == "__main__":
    key = jax.random.PRNGKey(0)
    kx, kw, kb, kx2, kx3 = jax.random.split(key, 5)

    # PyTorch-style init: U(-1/sqrt(fan_in), 1/sqrt(fan_in)) with fan_in = 1.
    weight = jax.random.uniform(kw, (1, 1), dtype=jnp.float32, minval=-1.0, maxval=1.0)
    bias = jax.random.uniform(kb, (1,), dtype=jnp.float32, minval=-1.0, maxval=1.0)

    # Module-shaped small input (auto-dispatches to the plain-JAX fast path).
    x_small = jax.random.normal(kx, (8, 1), dtype=jnp.float32)
    y_small = linear_regression_forward(x_small, weight, bias)
    jax.block_until_ready(y_small)
    ref_small = x_small @ weight.T + bias
    assert y_small.shape == (8, 1)
    assert jnp.allclose(y_small, ref_small, atol=1e-6), "small-batch mismatch"

    # LANE-multiple batch forced through the Pallas kernel (zero-copy reshape).
    x_big = jax.random.normal(kx2, (4096, 1), dtype=jnp.float32)
    y_big = linear_regression_forward(x_big, weight, bias, force_pallas=True)
    jax.block_until_ready(y_big)
    ref_big = x_big @ weight.T + bias
    assert y_big.shape == (4096, 1)
    assert jnp.allclose(y_big, ref_big, atol=1e-6), "pallas-path mismatch"

    # Non-LANE-multiple batch forced through Pallas: exercises the masked
    # partial last row-block and the plain-JAX tail.
    x_odd = jax.random.normal(kx3, (8741, 1), dtype=jnp.float32)
    y_odd = linear_regression_forward(x_odd, weight, bias, force_pallas=True)
    jax.block_until_ready(y_odd)
    ref_odd = x_odd @ weight.T + bias
    assert y_odd.shape == (8741, 1)
    assert jnp.allclose(y_odd, ref_odd, atol=1e-6), "ragged-path mismatch"

    print("KERNEL_OK")
</pallas_src>

<mosaic_0001>
module attributes {stable_mosaic.version = 11 : i64} {
  func.func @_affine_kernel(%arg0: i32, %arg1: memref<2xf32, #tpu.memory_space<smem>>, %arg2: memref<8x512xf32, #tpu.memory_space<vmem>>, %arg3: memref<8x512xf32, #tpu.memory_space<vmem>>) attributes {dimension_semantics = [#tpu.dimension_semantics<parallel>], iteration_bounds = array<i64: 1>, scalar_prefetch = 0 : i64, scratch_operands = 0 : i64, tpu.core_type = #tpu.core_type<tc>, window_params = [{transform_indices = @transform_0, window_bounds = array<i64: 2>}, {transform_indices = @transform_1, window_bounds = array<i64: 8, 512>}, {transform_indices = @transform_2, window_bounds = array<i64: 8, 512>}]} {
    %c0 = arith.constant 0 : index
    %0 = memref.load %arg1[%c0] : memref<2xf32, #tpu.memory_space<smem>>
    %c1 = arith.constant 1 : index
    %1 = memref.load %arg1[%c1] : memref<2xf32, #tpu.memory_space<smem>>
    %c0_0 = arith.constant 0 : index
    %c0_1 = arith.constant 0 : index
    %2 = vector.load %arg2[%c0_0, %c0_1] : memref<8x512xf32, #tpu.memory_space<vmem>>, vector<8x512xf32>
    %3 = vector.broadcast %0 : f32 to vector<8x512xf32>
    %4 = arith.mulf %2, %3 : vector<8x512xf32>
    %5 = vector.broadcast %1 : f32 to vector<8x512xf32>
    %6 = arith.addf %4, %5 : vector<8x512xf32>
    %c0_2 = arith.constant 0 : index
    %c0_3 = arith.constant 0 : index
    %7 = vector.load %arg3[%c0_2, %c0_3] : memref<8x512xf32, #tpu.memory_space<vmem>>, vector<8x512xf32>
    tpu.vector_store %arg3[%c0_2, %c0_3], %6 {strides = array<i32>} : memref<8x512xf32, #tpu.memory_space<vmem>>, vector<8x512xf32>,
    return
  }
  func.func @transform_0(%arg0: i32) -> i32 {
    %c0_i32 = arith.constant 0 : i32
    %c0_i32_0 = arith.constant 0 : i32
    return %c0_i32 : i32
  }
  func.func @transform_1(%arg0: i32) -> (i32, i32) {
    %c0_i32 = arith.constant 0 : i32
    %c0_i32_0 = arith.constant 0 : i32
    return %arg0, %c0_i32 : i32, i32
  }
  func.func @transform_2(%arg0: i32) -> (i32, i32) {
    %c0_i32 = arith.constant 0 : i32
    %c0_i32_0 = arith.constant 0 : i32
    return %arg0, %c0_i32 : i32, i32
  }
}

</mosaic_0001>

<bundles_post_ra>
// kernel: tpu_custom_call.1
= control target key start
LH: loop header
LB: loop body
LE: loop exit
PB: predicated region body
PF: predicated region fallthrough
CT: control target
= control target key end

     0   :  { %7 = vsyncpa [#allocation5], 0  ;;  %s174_s0 = inlined_call_operand.hbm [shape: f32[2], index: 0, kind: input, shape index: {}]   ;;  %s175_s1 = inlined_call_operand.hbm [shape: f32[8,512], index: 1, kind: input, shape index: {}]   ;;  %s176_s2 = inlined_call_operand.hbm [shape: f32[8,512], index: 2, kind: output, shape index: {}]  }
   0x1   :  { %8 = vsyncpa [#allocation3], 0 }
   0x2   :  { %9 = vsyncpa [#allocation4], 0  ;;  %s15_s11 = sshll.u32 %s174_s0, 4  ;;  %s24_s14 = sshll.u32 %s175_s1, 4  ;;  %s16_s11 = int_to_ptr.hbm [resolvable:$true] %s15_s11  ;;  %s25_s14 = int_to_ptr.hbm [resolvable:$true] %s24_s14 }
   0x3   :  { %s147_s15 = smov [#allocation2]   ;;  %s148_s16 = smov [#allocation6]  }
   0x4   :  { %18 = dma.hbm_to_smem %s16_s11, 16, %s147_s15, [#allocation5]  }
   0x5   :  { %s26_s17 = sshll.u32 %s148_s16, 4  ;;  %s27_s17 = int_to_ptr.vmem [resolvable:$true] %s26_s17 }
   0x6   :  { %29 = dma.hbm_to_vmem [thread:$0]  %s25_s14, 512, %s27_s17, [#allocation3]  }
   0x7   :  { %141 = dma.done.wait [#allocation5], 16  }
   0x8   :  { %142 = vsyncadd [#allocation5], 4294967280 }
   0x9   :  { %143 = dma.done.wait [#allocation3], 512  }
   0xa   :  { %144 = vsyncadd [#allocation3], 4294966784 }
   0xb   :  { %38 = sfence }
   0xc   :  { %s39_s18 = sld [smem:[#allocation2]]  ;;  %v41_v0 = vld [vmem:[#allocation6] sm:$0xff]  ;;  %v42_v1 = vld [vmem:[#allocation6 + $0x8] sm:$0xff]  ;;  %v43_v2 = vld [vmem:[#allocation6 + $0x10] sm:$0xff]  ;;  %s149_s0 = smov [#allocation7]  }
   0xd   :  { %s77_s19 = sld [smem:[#allocation2 + $0x1]]  ;;  %v44_v3 = vld [vmem:[#allocation6 + $0x18] sm:$0xff]  ;;  %s64_s1 = sshll.u32 %s149_s0, 4  ;;  %s65_s1 = int_to_ptr.vmem [resolvable:$true] %s64_s1 }
   0xe   :  { %s66_s22 = sshll.u32 %s176_s2, 4  ;;  %s67_s22 = int_to_ptr.hbm [resolvable:$true] %s66_s22 }
  0x12   :  { %v45_v4 = vstv %s39_s18 }
  0x13   :  { %v46_v5 = vmul.f32 %v45_v4, %v41_v0  ;;  %v50_v6 = vstv %s77_s19  ;;  %v47_v7 = vmul.f32 %v45_v4, %v42_v1  ;;  %v48_v8 = vmul.f32 %v45_v4, %v43_v2 }
  0x14   :  { %v49_v9 = vmul.f32 %v45_v4, %v44_v3 }
  0x15   :  { %v51_v10 = vadd.f32 %v50_v6, %v46_v5  ;;  %v52_v11 = vadd.f32 %v50_v6, %v47_v7  ;;  %v53_v12 = vadd.f32 %v50_v6, %v48_v8 }
  0x16   :  { %v54_v13 = vadd.f32 %v50_v6, %v49_v9 }
  0x17   :  { %55 = vst [vmem:[#allocation7] sm:$0xff] %v51_v10 }
  0x18   :  { %56 = vst [vmem:[#allocation7 + $0x8] sm:$0xff] %v52_v11 }
  0x19   :  { %57 = vst [vmem:[#allocation7 + $0x10] sm:$0xff] %v53_v12 }
  0x1a   :  { %58 = vst [vmem:[#allocation7 + $0x18] sm:$0xff] %v54_v13 }
  0x1b   :  { %69 = dma.vmem_to_hbm [thread:$0]  %s65_s1, 512, %s67_s22, [#allocation4]  }
  0x1c   :  { %145 = dma.done.wait [#allocation4], 512  }
  0x1d   :  { %146 = vsyncadd [#allocation4], 4294966784 }
  0x1e   :  { %74 = vsyncpa [#allocation3], 1 }
  0x1f   :  { %75 = vsyncpa [#allocation4], 1 }
  0x20   :  { %76 = vsyncpa [#allocation5], 1 }

</bundles_post_ra>
